<compile_context>
chip_gen: v7x
topology: tpu7x:2x2x1
jax: 0.10.0
libtpu: 0.0.40
codegen_flags: <defaults>
</compile_context>

<pallas_src>
import jax
import jax.numpy as jnp
from jax.experimental import pallas as pl
from jax.experimental.pallas import tpu as pltpu

_MIB = 2 ** 20
_F32 = 4


# ---------------------------------------------------------------------------
# Kernels
# ---------------------------------------------------------------------------
def _attention_compute(v, w_row, mask=None):
    """Shared body. v: (Bt, SEQ, D); w_row: (1, D) f32 (already /temperature);
    mask: optional (Bt, SEQ) float32, 1.0 => padded."""
    # Attention logits: VPU broadcast-multiply + lane (last-dim) reduce.
    # v is promoted to f32 inside the multiply (w_row is f32) — no whole-slab
    # f32 copy is kept live across the softmax.
    logits = jnp.sum(v * w_row[None, :, :], axis=-1)                 # (Bt, SEQ) f32

    if mask is not None:
        # MaskedLinear semantics: padded positions -> -inf (matches the
        # reference, including NaNs if an entire row is fully padded).
        logits = jnp.where(mask > 0.5, -jnp.inf, logits)

    # Softmax over SEQ (lane axis). Reciprocal on the EUP slot (exact).
    mx = jnp.max(logits, axis=-1, keepdims=True)                     # (Bt, 1)
    e = jnp.exp(logits - mx)                                         # (Bt, SEQ)
    s = jnp.sum(e, axis=-1, keepdims=True)                           # (Bt, 1)
    weights = e * pl.reciprocal(s, approx=False)                     # (Bt, SEQ)

    # Pooling: weights^T @ v == sum over SEQ of weights * v.
    # VPU multiply (v promoted to f32 by weights) + sublane reduce.
    scaled = jnp.sum(weights[:, :, None] * v, axis=1)                # (Bt, D)
    return weights, scaled


def _attention_kernel_masked(v_ref, mask_ref, w_ref, scaled_ref, weights_ref):
    weights, scaled = _attention_compute(
        v_ref[...], w_ref[...].astype(jnp.float32), mask=mask_ref[...])
    weights_ref[...] = weights.astype(weights_ref.dtype)
    scaled_ref[...] = scaled.astype(scaled_ref.dtype)


def _attention_kernel_nomask(v_ref, w_ref, scaled_ref, weights_ref):
    weights, scaled = _attention_compute(
        v_ref[...], w_ref[...].astype(jnp.float32), mask=None)
    weights_ref[...] = weights.astype(weights_ref.dtype)
    scaled_ref[...] = scaled.astype(scaled_ref.dtype)


# ---------------------------------------------------------------------------
# Wrapper
# ---------------------------------------------------------------------------
def _vmem_capacity_bytes():
    """Physical per-core VMEM; conservative (v7x-sized) fallback if unknown."""
    try:
        info = pltpu.get_tpu_info()
        cap = getattr(info, "vmem_capacity_bytes", None)
        if cap:
            return int(cap)
    except Exception:
        pass
    return 64 * _MIB


def basic_attention(v, w, mask=None, temperature=1.0, block_b=None):
    """v: (B, SEQ, D); w: (D, 1) (transpose of torch Linear(D, 1).weight);
    mask: optional (B, SEQ, 1) bool/float, True/nonzero where padded.

    Returns (scaled_attention (B, D), attention_weights (B, SEQ, 1)).
    """
    B, SEQ, D = v.shape
    itemsize = v.dtype.itemsize
    has_mask = mask is not None

    # Fold temperature into a lane-dense (1, D) f32 weight row (t > 0, so -inf
    # masked logits are unaffected by the scaling order).
    w_row = w.reshape(1, D).astype(jnp.float32) / float(temperature)

    # Lane-dense float mask (B, SEQ), 1.0 => padded. (mask != 0) matches the
    # reference's truthiness for non-{0,1} float masks too.
    if has_mask:
        mask_f = (mask.reshape(B, SEQ) != 0).astype(jnp.float32)

    # ---- Generation-aware budgets -----------------------------------------
    phys_vmem = _vmem_capacity_bytes()
    if phys_vmem <= 64 * _MIB:
        # v7x: 64 MiB physical VMEM/TC, 3.2 TB/s HBM -> bigger tiles to hide
        # the ~0.35 us per-grid-step overhead; leave headroom below physical.
        vmem_cap = 48 * _MIB
        target_tile_bytes = 8 * _MIB
    else:
        # v5e / v6e: 128 MiB physical VMEM.
        vmem_cap = min(96 * _MIB, phys_vmem * 3 // 4)
        target_tile_bytes = 4 * _MIB

    # Per-batch-row footprints.
    row_hbm = SEQ * D * itemsize                       # HBM bytes streamed per row (v)
    row_vmem = (SEQ * D * (2 * itemsize + 3 * _F32)    # v double-buffer + f32 temporaries
                + SEQ * ((2 * _F32 if has_mask else 0)  # mask double-buffer
                         + 2 * itemsize                 # weights-out double-buffer
                         + 2 * _F32)                    # logits / exp rows
                + D * 2 * itemsize)                     # scaled-out double-buffer
    usable_vmem = vmem_cap - 2 * _MIB                  # weight row + Mosaic internals

    # ---- Batch block size ---------------------------------------------------
    if block_b is not None:
        bt = min(int(block_b), B)
        if bt < B:
            bt = max(8, (bt // 8) * 8)                 # (8, 128) sublane constraint
    elif B <= 8:
        bt = B
    else:
        bt = max(8, min(B, (target_tile_bytes // max(row_hbm, 1)) // 8 * 8))
        if B >= 16:
            # Keep >= 2 grid steps so "parallel" feeds both v7x TensorCores.
            bt = min(bt, max(8, (B // 2) // 8 * 8))
        # Keep the working set inside the per-generation usable VMEM.
        bt = min(bt, max(8, (usable_vmem // max(row_vmem, 1)) // 8 * 8))
        if bt >= B:
            bt = B

    # No jnp.pad: grid covers B with a (masked) partial last block if needed.
    grid_b = pl.cdiv(B, bt)

    vmem_limit = int(min(vmem_cap, max(32 * _MIB, bt * row_vmem + 2 * _MIB)))

    cost = pl.CostEstimate(
        flops=int(4 * B * SEQ * D),
        transcendentals=int(B * SEQ),
        bytes_accessed=int(
            B * SEQ * D * itemsize                      # v
            + (B * SEQ * _F32 if has_mask else 0)       # mask
            + D * _F32                                  # weight row
            + B * D * itemsize                          # scaled out
            + B * SEQ * itemsize                        # weights out
        ),
    )

    v_spec = pl.BlockSpec((bt, SEQ, D), lambda b: (b, 0, 0))
    w_spec = pl.BlockSpec((1, D), lambda b: (0, 0))
    if has_mask:
        kernel = _attention_kernel_masked
        in_specs = [v_spec, pl.BlockSpec((bt, SEQ), lambda b: (b, 0)), w_spec]
        operands = (v, mask_f, w_row)
    else:
        kernel = _attention_kernel_nomask
        in_specs = [v_spec, w_spec]
        operands = (v, w_row)

    scaled, weights = pl.pallas_call(
        kernel,
        out_shape=(
            jax.ShapeDtypeStruct((B, D), v.dtype),
            jax.ShapeDtypeStruct((B, SEQ), v.dtype),    # lane-dense weights
        ),
        grid_spec=pltpu.PrefetchScalarGridSpec(
            num_scalar_prefetch=0,
            grid=(grid_b,),
            in_specs=in_specs,
            out_specs=[
                # Note: for D < 128 the scaled tile is a lane-masked partial
                # store (only matters on v5e's single vst slot).
                pl.BlockSpec((bt, D), lambda b: (b, 0)),    # scaled attention
                pl.BlockSpec((bt, SEQ), lambda b: (b, 0)),  # attention weights
            ],
        ),
        compiler_params=pltpu.CompilerParams(
            dimension_semantics=("parallel",),
            vmem_limit_bytes=vmem_limit,
        ),
        cost_estimate=cost,
    )(*operands)

    return scaled, weights.reshape(B, SEQ, 1)   # free layout plumbing back to (B, SEQ, 1)


# ---------------------------------------------------------------------------
# Reference + tests
# ---------------------------------------------------------------------------
def _reference(v, w, mask, temperature):
    # Pure elementwise/reduce reference (no MXU precision ambiguity).
    logits = jnp.sum(v * w[:, 0][None, None, :], axis=-1, keepdims=True)   # (B, SEQ, 1)
    if mask is not None:
        logits = jnp.where(mask, -jnp.inf, logits)
    logits = logits / temperature
    weights = jax.nn.softmax(logits, axis=1)
    scaled = jnp.sum(weights * v, axis=1)
    return scaled, weights


if __name__ == "__main__":
    # --- Small config (single grid step, bt == B), with mask ---------------
    B, SEQ, D = 2, 8, 32
    temperature = 1.5

    key = jax.random.PRNGKey(0)
    kv, kw = jax.random.split(key, 2)
    v = jax.random.normal(kv, (B, SEQ, D), dtype=jnp.float32)
    w = (jax.random.normal(kw, (D, 1), dtype=jnp.float32) / jnp.sqrt(D)).astype(jnp.float32)
    mask = jnp.zeros((B, SEQ, 1), dtype=bool).at[1, SEQ - 2:, 0].set(True)

    scaled, weights = basic_attention(v, w, mask=mask, temperature=temperature)
    jax.block_until_ready((scaled, weights))
    ref_scaled, ref_weights = _reference(v, w, mask, temperature)
    assert scaled.shape == (B, D)
    assert weights.shape == (B, SEQ, 1)
    assert jnp.allclose(scaled, ref_scaled, atol=1e-5, rtol=1e-5)
    assert jnp.allclose(weights, ref_weights, atol=1e-5, rtol=1e-5)

    # --- Same shapes, no mask (exercises the specialized no-mask kernel) ---
    s_nm, w_nm = basic_attention(v, w, mask=None, temperature=temperature)
    jax.block_until_ready((s_nm, w_nm))
    r_s_nm, r_w_nm = _reference(v, w, None, temperature)
    assert jnp.allclose(s_nm, r_s_nm, atol=1e-5, rtol=1e-5)
    assert jnp.allclose(w_nm, r_w_nm, atol=1e-5, rtol=1e-5)

    # --- Larger config: multi-step grid with a PARTIAL last block (B=20,
    # bt=8 -> grid 3, rows 20..23 OOB) and NO wrapper-side padding ----------
    B2, SEQ2, D2 = 20, 128, 128
    k2v, k2w, k2m = jax.random.split(jax.random.PRNGKey(0), 3)
    v2 = jax.random.normal(k2v, (B2, SEQ2, D2), dtype=jnp.float32)
    w2 = (jax.random.normal(k2w, (D2, 1), dtype=jnp.float32) / jnp.sqrt(D2)).astype(jnp.float32)
    mask2 = jax.random.bernoulli(k2m, 0.2, (B2, SEQ2, 1))
    mask2 = mask2.at[:, 0, 0].set(False)   # keep at least one unmasked position per row

    s2, wt2 = basic_attention(v2, w2, mask=mask2, temperature=2.0, block_b=8)
    jax.block_until_ready((s2, wt2))
    r_s2, r_w2 = _reference(v2, w2, mask2, 2.0)
    assert jnp.allclose(s2, r_s2, atol=1e-5, rtol=1e-5)
    assert jnp.allclose(wt2, r_w2, atol=1e-5, rtol=1e-5)

    print("KERNEL_OK")
</pallas_src>

<mosaic_0001>
module attributes {stable_mosaic.version = 11 : i64} {
  func.func @_attention_kernel_masked(%arg0: i32, %arg1: memref<2x8x32xf32, #tpu.memory_space<vmem>>, %arg2: memref<2x8xf32, #tpu.memory_space<vmem>>, %arg3: memref<1x32xf32, #tpu.memory_space<vmem>>, %arg4: memref<2x32xf32, #tpu.memory_space<vmem>>, %arg5: memref<2x8xf32, #tpu.memory_space<vmem>>) attributes {dimension_semantics = [#tpu.dimension_semantics<parallel>], iteration_bounds = array<i64: 1>, scalar_prefetch = 0 : i64, scratch_operands = 0 : i64, tpu.core_type = #tpu.core_type<tc>, window_params = [{transform_indices = @transform_0, window_bounds = array<i64: 2, 8, 32>}, {transform_indices = @transform_1, window_bounds = array<i64: 2, 8>}, {pipeline_mode = #tpu.pipeline_mode<synchronous>, transform_indices = @transform_2, window_bounds = array<i64: 1, 32>}, {transform_indices = @transform_3, window_bounds = array<i64: 2, 32>}, {transform_indices = @transform_4, window_bounds = array<i64: 2, 8>}]} {
    %c0 = arith.constant 0 : index
    %c0_0 = arith.constant 0 : index
    %c0_1 = arith.constant 0 : index
    %0 = vector.load %arg1[%c0, %c0_0, %c0_1] : memref<2x8x32xf32, #tpu.memory_space<vmem>>, vector<2x8x32xf32>
    %c0_2 = arith.constant 0 : index
    %c0_3 = arith.constant 0 : index
    %1 = vector.load %arg3[%c0_2, %c0_3] : memref<1x32xf32, #tpu.memory_space<vmem>>, vector<1x32xf32>
    %c0_4 = arith.constant 0 : index
    %c0_5 = arith.constant 0 : index
    %2 = vector.load %arg2[%c0_4, %c0_5] : memref<2x8xf32, #tpu.memory_space<vmem>>, vector<2x8xf32>
    %3 = vector.shape_cast %1 : vector<1x32xf32> to vector<1x1x32xf32>
    %4 = vector.broadcast %3 : vector<1x1x32xf32> to vector<2x8x32xf32>
    %5 = arith.mulf %0, %4 : vector<2x8x32xf32>
    %cst = arith.constant dense<0.000000e+00> : vector<2x8xf32>
    %6 = vector.multi_reduction <add>, %5, %cst [2] : vector<2x8x32xf32> to vector<2x8xf32>
    %cst_6 = arith.constant 5.000000e-01 : f32
    %7 = vector.broadcast %cst_6 : f32 to vector<2x8xf32>
    %8 = arith.cmpf ogt, %2, %7 : vector<2x8xf32>
    %cst_7 = arith.constant 0xFF800000 : f32
    %9 = vector.broadcast %cst_7 : f32 to vector<2x8xf32>
    %10 = arith.select %8, %9, %6 : vector<2x8xi1>, vector<2x8xf32>
    %cst_8 = arith.constant dense<0xFF800000> : vector<2xf32>
    %11 = vector.multi_reduction <maximumf>, %10, %cst_8 [1] : vector<2x8xf32> to vector<2xf32>
    %12 = vector.shape_cast %11 : vector<2xf32> to vector<2x1xf32>
    %13 = vector.broadcast %12 : vector<2x1xf32> to vector<2x8xf32>
    %14 = arith.subf %10, %13 : vector<2x8xf32>
    %15 = math.exp %14 : vector<2x8xf32>
    %cst_9 = arith.constant dense<0.000000e+00> : vector<2xf32>
    %16 = vector.multi_reduction <add>, %15, %cst_9 [1] : vector<2x8xf32> to vector<2xf32>
    %17 = vector.shape_cast %16 : vector<2xf32> to vector<2x1xf32>
    %18 = tpu.reciprocal %17 : vector<2x1xf32> -> vector<2x1xf32>
    %19 = vector.broadcast %18 : vector<2x1xf32> to vector<2x8xf32>
    %20 = arith.mulf %15, %19 : vector<2x8xf32>
    %21 = vector.shape_cast %20 : vector<2x8xf32> to vector<2x8x1xf32>
    %22 = vector.broadcast %21 : vector<2x8x1xf32> to vector<2x8x32xf32>
    %23 = arith.mulf %22, %0 : vector<2x8x32xf32>
    %cst_10 = arith.constant dense<0.000000e+00> : vector<2x32xf32>
    %24 = vector.multi_reduction <add>, %23, %cst_10 [1] : vector<2x8x32xf32> to vector<2x32xf32>
    %c0_11 = arith.constant 0 : index
    %c0_12 = arith.constant 0 : index
    %25 = vector.load %arg5[%c0_11, %c0_12] : memref<2x8xf32, #tpu.memory_space<vmem>>, vector<2x8xf32>
    tpu.vector_store %arg5[%c0_11, %c0_12], %20 {strides = array<i32>} : memref<2x8xf32, #tpu.memory_space<vmem>>, vector<2x8xf32>,
    %c0_13 = arith.constant 0 : index
    %c0_14 = arith.constant 0 : index
    %26 = vector.load %arg4[%c0_13, %c0_14] : memref<2x32xf32, #tpu.memory_space<vmem>>, vector<2x32xf32>
    tpu.vector_store %arg4[%c0_13, %c0_14], %24 {strides = array<i32>} : memref<2x32xf32, #tpu.memory_space<vmem>>, vector<2x32xf32>,
    return
  }
  func.func @transform_0(%arg0: i32) -> (i32, i32, i32) {
    %c0_i32 = arith.constant 0 : i32
    %c0_i32_0 = arith.constant 0 : i32
    %c0_i32_1 = arith.constant 0 : i32
    return %arg0, %c0_i32, %c0_i32_0 : i32, i32, i32
  }
  func.func @transform_1(%arg0: i32) -> (i32, i32) {
    %c0_i32 = arith.constant 0 : i32
    %c0_i32_0 = arith.constant 0 : i32
    return %arg0, %c0_i32 : i32, i32
  }
  func.func @transform_2(%arg0: i32) -> (i32, i32) {
    %c0_i32 = arith.constant 0 : i32
    %c0_i32_0 = arith.constant 0 : i32
    %c0_i32_1 = arith.constant 0 : i32
    return %c0_i32, %c0_i32_0 : i32, i32
  }
  func.func @transform_3(%arg0: i32) -> (i32, i32) {
    %c0_i32 = arith.constant 0 : i32
    %c0_i32_0 = arith.constant 0 : i32
    return %arg0, %c0_i32 : i32, i32
  }
  func.func @transform_4(%arg0: i32) -> (i32, i32) {
    %c0_i32 = arith.constant 0 : i32
    %c0_i32_0 = arith.constant 0 : i32
    return %arg0, %c0_i32 : i32, i32
  }
}

</mosaic_0001>

<bundles_post_ra>
// kernel: tpu_custom_call.1
= control target key start
LH: loop header
LB: loop body
LE: loop exit
PB: predicated region body
PF: predicated region fallthrough
CT: control target
= control target key end

     0   :  { %10 = vsyncpa [#allocation3], 0  ;;  %s313_s0 = inlined_call_operand.hbm [shape: f32[2,8,32], index: 0, kind: input, shape index: {}]   ;;  %s314_s1 = inlined_call_operand.vmem [shape: f32[2,8], index: 1, kind: input, shape index: {}]   ;;  %s315_s2 = inlined_call_operand.vmem [shape: f32[1,32], index: 2, kind: input, shape index: {}]   ;;  %s316_s3 = inlined_call_operand.hbm [shape: f32[2,32], index: 3, kind: output, shape index: {0}]   ;;  %s317_s4 = inlined_call_operand.hbm [shape: f32[2,8], index: 4, kind: output, shape index: {1}]  }
   0x1   :  { %11 = vsyncpa [#allocation4], 0 }
   0x2   :  { %12 = vsyncpa [#allocation7], 0  ;;  %s228_s15 = smov [#allocation2]   ;;  %s156_s19 = scalar_lea.hbm %s313_s0, 256 }
   0x3   :  { %s18_s16 = sshll.u32 %s228_s15, 4  ;;  %p157_p0 = scmp.ne.s32.totalorder %s313_s0, %s156_s19  ;;  %s19_s16 = int_to_ptr.vmem [resolvable:$true] %s18_s16 }
   0x4   :  { %p160_p1 = scmp.lt.u32.totalorder %s156_s19, %s313_s0 }
   0x6   :  { %p162_p2 = pnand %p160_p1, %p157_p0 }
   0x8   :  { %165 = shalt.err (!%p162_p2)
}
   0x9   :  { %s166_s24 = scalar_lea.vmem %s19_s16, 256  ;;  %p171_p4 = scmp.lt.s32.totalorder %s19_s16, %s19_s16 }
   0xa   :  { %p167_p3 = scmp.ne.s32.totalorder %s19_s16, %s166_s24  ;;  %p172_p5 = scmp.lt.s32.totalorder %s166_s24, %s166_s24 }
   0xc   :  { %p173_p6 = por %p172_p5, %p171_p4 }
   0xe   :  { %p174_p7 = pnand %p173_p6, %p167_p3 }
  0x10   :  { %177 = shalt.err (!%p174_p7)
}
  0x11   :  { %s229_s25 = smov 128   ;;  %s230_s26 = smov 8  }
  0x12   :  { %24 = dma.hbm_to_vmem [thread:$0]  %s313_s0, 256, %s19_s16, [#allocation3], %s229_s25, %s229_s25, %s230_s26  }
  0x13   :  { %222 = dma.done.wait [#allocation3], 256  }
  0x14   :  { %223 = vsyncadd [#allocation3], 4294967040  ;;  %v270_v0 = vld [vmem:[#allocation2] sm:$0xff]  ;;  %vm44_vm0 = vcmask 261120   ;;  %v33_v2 = vld [vmem:[#allocation2 + $0x8] sm:$0xff]  ;;  %v54_v7 = vlaneseq  ;;  %vm64_vm1 = vcmask 1041409  }
  0x15   :  { %v146_v1 = vld [vmem:[%s315_s2] ss:$0 sm:$0xff]  ;;  %vm68_vm3 = vcmask 58368  }
  0x16   :  { %v42_v3 = vmul.f32 %v146_v1, %v270_v0  ;;  %v43_v4 = vmul.f32 %v146_v1, %v33_v2  ;;  %v55_v8 = vand.u32 127, %v54_v7  ;;  %v57_v9 = vshrl.u32 %v54_v7, 7  ;;  %v35_v12 = vld [vmem:[%s314_s1] sm:$0x3]  ;;  %s231_s1 = smov [#allocation6]  }
  0x17   :  { %vm51_vm2 = vcmp.gt.f32.partialorder %v35_v12, 0.5  ;;  %s133_s2 = sshll.u32 %s231_s1, 4  ;;  %s134_s2 = int_to_ptr.vmem [resolvable:$true] %s133_s2 }
  0x18   :  { %v45_v5 = vsel %vm44_vm0, %v42_v3, 0.0  ;;  %v48_v6 = vsel %vm44_vm0, %v43_v4, 0.0  ;;  %v58_v11 = vsub.s32 %v55_v8, %v57_v9  ;;  %v89_v25 = vsub.s32 1, %v57_v9  ;;  %s178_s6 = scalar_lea.vmem %s134_s2, 32  ;;  %p183_p9 = scmp.lt.s32.totalorder %s134_s2, %s134_s2 }
  0x19   :  { %46 = vadd.xlane.f32.xlu0 %v45_v5  ;;  %v82_v26 = vsub.s32 0, %v57_v9  ;;  %p179_p8 = scmp.ne.s32.totalorder %s134_s2, %s178_s6  ;;  %p184_p10 = scmp.lt.s32.totalorder %s178_s6, %s178_s6 }
  0x1b   :  { %p185_p11 = por %p184_p10, %p183_p9 }
  0x1d   :  { %49 = vadd.xlane.f32.xlu0 %v48_v6  ;;  %p186_p12 = pnand %p185_p11, %p179_p8 }
  0xa6   :  { %v47_v10 = vpop.xlane.xlu0 %46 }
  0xa7   :  { %v59_v14 = vrot.slane %v47_v10, %v58_v11 }
  0xaa   :  { %v50_v13 = vpop.xlane.xlu0 %49 }
  0xab   :  { %v63_v15 = vrot.slane %v50_v13, %v58_v11 }
  0xad   :  { %v65_v16 = vsel %vm64_vm1, %v63_v15, %v59_v14 }
  0xae   :  { %v67_v17 = vsel %vm51_vm2, -inf, %v65_v16 }
  0xaf   :  { %v69_v18 = vsel %vm68_vm3, %v67_v17, -inf }
  0xb0   :  { %70 = vmax.xlane.f32.xlu1 %v69_v18 }
 0x13d   :  { %v71_v19 = vpop.xlane.xlu1 %70 }
 0x13e   :  { %v72_v20 = vsub.f32 %v67_v17, %v71_v19 }
 0x140   :  { %v73_v21 = vmul.f32 1.442695, %v72_v20 }
 0x142   :  { %152 = vpow2.f32 %v73_v21 }
 0x14c   :  { %v153_v22 = vpop.eup %152 }
 0x14d   :  { %v75_v23 = vsel %vm68_vm3, %v153_v22, 0.0 }
 0x14e   :  { %76 = vadd.xlane.f32.xlu1 %v75_v23 }
 0x1db   :  { %v77_v24 = vpop.xlane.xlu1 %76 }
 0x1dc   :  { %154 = vrcp.f32 %v77_v24 }
 0x1e6   :  { %v155_v27 = vpop.eup %154 }
 0x1e7   :  { %v79_v28 = vmul.f32 %v155_v27, %v153_v22 }
 0x1e9   :  { %v90_v29 = vrot.slane %v79_v28, %v89_v25  ;;  %110 = vst.msk [vmem:[#allocation6] sm:$0x3] %vm68_vm3, %v79_v28  ;;  %v83_v30 = vrot.slane %v79_v28, %v82_v26 }
 0x1eb   :  { %92 = vbcast.lane.b32.xlu1 %v90_v29, 256  ;;  %85 = vbcast.lane.b32.xlu0 %v83_v30, 256 }
 0x1ec   :  { %189 = shalt.err (!%p186_p12)
}
 0x1ed   :  { %s190_s9 = scalar_lea.hbm %s317_s4, 32 }
 0x1ee   :  { %p191_p13 = scmp.ne.s32.totalorder %s317_s4, %s190_s9  ;;  %p194_p0 = scmp.lt.u32.totalorder %s190_s9, %s317_s4 }
 0x1f0   :  { %p196_p1 = pnand %p194_p0, %p191_p13 }
 0x1f2   :  { %199 = shalt.err (!%p196_p1)
}
 0x1f3   :  { %136 = dma.vmem_to_hbm [thread:$0]  %s134_s2, 32, %s317_s4, [#allocation7]   ;;  %vm115_vm4 = vcmask 254976  }
 0x1f4   :  { %s232_s4 = smov [#allocation5]  }
 0x1f5   :  { %s123_s16 = sshll.u32 %s232_s4, 4  ;;  %s124_s16 = int_to_ptr.vmem [resolvable:$true] %s123_s16 }
 0x1f6   :  { %s200_s17 = scalar_lea.vmem %s124_s16, 32  ;;  %p205_p3 = scmp.lt.s32.totalorder %s124_s16, %s124_s16 }
 0x1f7   :  { %p201_p2 = scmp.ne.s32.totalorder %s124_s16, %s200_s17  ;;  %p206_p4 = scmp.lt.s32.totalorder %s200_s17, %s200_s17 }
 0x1f9   :  { %p207_p5 = por %p206_p4, %p205_p3 }
 0x1fb   :  { %p208_p6 = pnand %p207_p5, %p201_p2 }
 0x25d   :  { %v93_v31 = vpop.permute.xlu1 %92  ;;  %v86_v32 = vpop.permute.xlu0 %85 }
 0x25e   :  { %v95_v33 = vmul.f32 %v93_v31, %v33_v2  ;;  %v94_v34 = vmul.f32 %v86_v32, %v270_v0 }
 0x260   :  { %v103_v35 = vsel %vm44_vm0, %v95_v33, 0.0  ;;  %v96_v36 = vsel %vm44_vm0, %v94_v34, 0.0 }
 0x261   :  { %v104_v37 = vrot.slane %v103_v35, 4  ;;  %v97_v38 = vrot.slane %v96_v36, 4 }
 0x263   :  { %v105_v39 = vadd.f32 %v104_v37, %v103_v35  ;;  %v98_v40 = vadd.f32 %v97_v38, %v96_v36 }
 0x265   :  { %v106_v41 = vrot.slane %v105_v39, 2  ;;  %v99_v42 = vrot.slane %v98_v40, 2 }
 0x267   :  { %v107_v43 = vadd.f32 %v106_v41, %v105_v39  ;;  %v100_v44 = vadd.f32 %v99_v42, %v98_v40 }
 0x269   :  { %v108_v45 = vrot.slane %v107_v43, 1  ;;  %v101_v46 = vrot.slane %v100_v44, 1 }
 0x26b   :  { %v109_v47 = vadd.f32 %v108_v45, %v107_v43  ;;  %v102_v48 = vadd.f32 %v101_v46, %v100_v44 }
 0x26d   :  { %v113_v49 = vsel %vm64_vm1, %v109_v47, %v102_v48 }
 0x26e   :  { %116 = vst.msk [vmem:[#allocation5] sm:$0x3] %vm115_vm4, %v113_v49 }
 0x26f   :  { %211 = shalt.err (!%p208_p6)
}
 0x270   :  { %s212_s20 = scalar_lea.hbm %s316_s3, 32 }
 0x271   :  { %p213_p7 = scmp.ne.s32.totalorder %s316_s3, %s212_s20  ;;  %p216_p8 = scmp.lt.u32.totalorder %s212_s20, %s316_s3 }
 0x273   :  { %p218_p9 = pnand %p216_p8, %p213_p7 }
 0x275   :  { %221 = shalt.err (!%p218_p9)
}
 0x276   :  { %126 = dma.vmem_to_hbm [thread:$0]  %s124_s16, 32, %s316_s3, [#allocation4]  }
 0x277   :  { %224 = dma.done.wait [#allocation4], 32  }
 0x278   :  { %225 = vsyncadd [#allocation4], 4294967264 }
 0x279   :  { %226 = dma.done.wait [#allocation7], 32  }
 0x27a   :  { %227 = vsyncadd [#allocation7], 4294967264 }
 0x27b   :  { %143 = vsyncpa [#allocation3], 1 }
 0x27c   :  { %144 = vsyncpa [#allocation4], 1 }
 0x27d   :  { %145 = vsyncpa [#allocation7], 1 }

</bundles_post_ra>
